<compile_context>
chip_gen: v7x
topology: tpu7x:2x2x1
jax: 0.10.0
libtpu: 0.0.40
codegen_flags: <defaults>
</compile_context>

<pallas_src>
import functools

import jax
import jax.numpy as jnp
import numpy as np
from jax.experimental import pallas as pl
from jax.experimental.pallas import tpu as pltpu

EPS = 1e-5

_TIME_TILE_CANDIDATES = (32768, 16384, 8192, 4096, 2048, 1024, 512, 256, 128)
# Combined (x + c + out) bytes per grid step.  ~4 MiB single-buffered
# (~8-9 MiB double-buffered) amortizes per-step overhead while fitting the
# v7x 32 MiB scoped-VMEM default with plenty of headroom.
_TARGET_BLOCK_BYTES = 4 * 1024 * 1024
_VMEM_LIMIT_BYTES = 32 * 1024 * 1024


def _pick_blocks(B, T, per_col_bytes):
    """Pick (batch_block bB, time_tile tT) so one step moves ~_TARGET bytes."""
    divs = [t for t in _TIME_TILE_CANDIDATES if T % t == 0]
    if not divs:
        # TODO(synk): pad ragged T to a multiple of 128 (mask stats, crop out)
        # to keep stores lane-dense; full-T single tile stays correct.
        tT = T
    else:
        tT = divs[-1]
        for t in divs:  # descending: largest candidate that fits the budget
            if t * per_col_bytes <= _TARGET_BLOCK_BYTES:
                tT = t
                break
    max_bb = max(1, _TARGET_BLOCK_BYTES // max(1, tT * per_col_bytes))
    bB = 1
    for cand in range(min(B, max_bb), 0, -1):
        if B % cand == 0:
            bB = cand
            break
    return bB, tT


def _stats_kernel(inv_n, bB,
                  x_ref, g0_ref, be0_ref, g1_ref, be1_ref, w0_ref,
                  s0_ref, t0_ref, s1_ref, t1_ref):
    """Two-phase batch statistics with resident VMEM accumulators.

    Phase 0: accumulate sum/sumsq of x; finalize bn_0 scale/shift in place.
    Phase 1: recompute net0 = w0 @ relu(bn0(x)) per tile (no b0 -- it cancels
             through BN), accumulate sum/sumsq; finalize bn_1 scale/shift.
    """
    p = pl.program_id(0)
    b = pl.program_id(1)
    t = pl.program_id(2)
    last_tile = (b == pl.num_programs(1) - 1) & (t == pl.num_programs(2) - 1)

    @pl.when((p == 0) & (b == 0) & (t == 0))
    def _init():
        s0_ref[...] = jnp.zeros_like(s0_ref)
        t0_ref[...] = jnp.zeros_like(t0_ref)
        s1_ref[...] = jnp.zeros_like(s1_ref)
        t1_ref[...] = jnp.zeros_like(t1_ref)

    @pl.when(p == 0)
    def _acc_x():
        @pl.loop(0, bB)
        def _(bi):
            xb = x_ref[bi].astype(jnp.float32)            # (in_dim, tT)
            s0_ref[...] += jnp.sum(xb, axis=1, keepdims=True)
            t0_ref[...] += jnp.sum(xb * xb, axis=1, keepdims=True)

    @pl.when((p == 0) & last_tile)
    def _finalize_bn0():
        m = s0_ref[...] * inv_n
        v = t0_ref[...] * inv_n - m * m
        sc = g0_ref[...] * jax.lax.rsqrt(v + EPS)
        s0_ref[...] = sc
        t0_ref[...] = be0_ref[...] - m * sc

    @pl.when(p == 1)
    def _acc_net():
        @pl.loop(0, bB)
        def _(bi):
            xb = x_ref[bi].astype(jnp.float32)            # (in_dim, tT)
            h = jnp.maximum(xb * s0_ref[...] + t0_ref[...], 0.0)   # relu(bn_0)
            net0 = jnp.dot(w0_ref[...], h.astype(jnp.bfloat16),
                           preferred_element_type=jnp.float32)     # fc_0 (no b0)
            s1_ref[...] += jnp.sum(net0, axis=1, keepdims=True)
            t1_ref[...] += jnp.sum(net0 * net0, axis=1, keepdims=True)

    @pl.when((p == 1) & last_tile)
    def _finalize_bn1():
        # b0 is a per-channel constant: it shifts the mean and cancels exactly
        # in (net - mean), so stats of net0 = net - b0 give the same affine.
        m = s1_ref[...] * inv_n
        v = t1_ref[...] * inv_n - m * m
        sc = g1_ref[...] * jax.lax.rsqrt(v + EPS)
        s1_ref[...] = sc
        t1_ref[...] = be1_ref[...] - m * sc


def _apply_kernel(use_shortcut, bB,
                  x_ref, c_ref, s0_ref, t0_ref, s1_ref, t1_ref,
                  w0_ref, w1_ref, wc_ref, bf_ref, *rest):
    """Per-tile apply: BN FMAs + fc_0 + separate bf16 dots for fc_1/fc_c/shortcut."""
    if use_shortcut:
        ws_ref, o_ref = rest
    else:
        (o_ref,) = rest

    @pl.loop(0, bB)
    def _(bi):
        xb = x_ref[bi].astype(jnp.float32)                      # (in_dim, tT)
        h = jnp.maximum(xb * s0_ref[...] + t0_ref[...], 0.0)    # relu(bn_0)
        net0 = jnp.dot(w0_ref[...], h.astype(jnp.bfloat16),
                       preferred_element_type=jnp.float32)      # fc_0 (b0 folded)
        h1 = jnp.maximum(net0 * s1_ref[...] + t1_ref[...], 0.0)  # relu(bn_1)

        cb = c_ref[bi]                                          # (c_pad, tT)
        out = (jnp.dot(w1_ref[...], h1.astype(jnp.bfloat16),
                       preferred_element_type=jnp.float32)       # fc_1
               + jnp.dot(wc_ref[...], cb.astype(jnp.bfloat16),
                         preferred_element_type=jnp.float32)     # fc_c
               + bf_ref[...])                                    # b1 + bc
        if use_shortcut:
            out = out + jnp.dot(ws_ref[...], xb.astype(jnp.bfloat16),
                                preferred_element_type=jnp.float32)
        else:
            out = out + xb                                       # identity shortcut
        o_ref[bi] = out.astype(o_ref.dtype)


def _col(v, n):
    return jnp.asarray(v, jnp.float32).reshape(n, 1)


def resnet_block_conv1d(x, c, params):
    """x: (B, in_dim, T), c: (B, c_dim, T) -> (B, out_dim, T).

    params use the PyTorch Conv1d orientation with the kernel-size-1 axis
    squeezed:
      g0, be0: (in_dim,)    bn_0 affine     g1, be1: (hidden,)  bn_1 affine
      w0: (hidden, in_dim)  b0: (hidden,)   fc_0
      w1: (out_dim, hidden) b1: (out_dim,)  fc_1
      wc: (out_dim, c_dim)  bc: (out_dim,)  fc_c
      ws: (out_dim, in_dim)                 shortcut (only when in_dim != out_dim)
    """
    B, in_dim, T = x.shape
    Bc, c_dim, Tc = c.shape
    assert (B, T) == (Bc, Tc)
    hidden = params["w0"].shape[0]
    out_dim = params["wc"].shape[0]
    use_shortcut = in_dim != out_dim
    N = B * T

    # ---- host-side (once per call) weight prep: bf16 weights, f32 biases ----
    w0 = jnp.asarray(params["w0"], jnp.bfloat16)
    w1 = jnp.asarray(params["w1"], jnp.bfloat16)
    g0, be0 = _col(params["g0"], in_dim), _col(params["be0"], in_dim)
    g1, be1 = _col(params["g1"], hidden), _col(params["be1"], hidden)
    bf = _col(params["b1"], out_dim) + _col(params["bc"], out_dim)
    # NOTE: b0 is intentionally unused -- it cancels through training-mode BN.

    # Pad c's channel axis to a multiple of 8 so its dot operand is aligned.
    c_pad_dim = -(-c_dim // 8) * 8
    if c_pad_dim != c_dim:
        c_in = jnp.pad(c, ((0, 0), (0, c_pad_dim - c_dim), (0, 0)))
        wc = jnp.asarray(jnp.pad(params["wc"], ((0, 0), (0, c_pad_dim - c_dim))),
                         jnp.bfloat16)
    else:
        c_in, wc = c, jnp.asarray(params["wc"], jnp.bfloat16)
    ws = jnp.asarray(params["ws"], jnp.bfloat16) if use_shortcut else None

    # ---- block sizing: ~4 MiB of activations per grid step ------------------
    itemsize = jnp.dtype(x.dtype).itemsize
    per_col = (in_dim + c_pad_dim + out_dim) * itemsize   # bytes per time column
    bB, tT = _pick_blocks(B, T, per_col)
    nB, nT = B // bB, T // tT

    def rep(shape):
        return pl.BlockSpec(shape, lambda *_: (0,) * len(shape))

    cparams_seq = pltpu.CompilerParams(
        dimension_semantics=("arbitrary", "arbitrary", "arbitrary"),
        vmem_limit_bytes=_VMEM_LIMIT_BYTES)
    cparams_par = pltpu.CompilerParams(
        dimension_semantics=("parallel", "parallel"),
        vmem_limit_bytes=_VMEM_LIMIT_BYTES)

    # ---- pass 1: batch-norm statistics (sequential two-phase reduction) -----
    stats_fn = pl.pallas_call(
        functools.partial(_stats_kernel, 1.0 / N, bB),
        out_shape=(jax.ShapeDtypeStruct((in_dim, 1), jnp.float32),
                   jax.ShapeDtypeStruct((in_dim, 1), jnp.float32),
                   jax.ShapeDtypeStruct((hidden, 1), jnp.float32),
                   jax.ShapeDtypeStruct((hidden, 1), jnp.float32)),
        grid_spec=pltpu.PrefetchScalarGridSpec(
            num_scalar_prefetch=0,
            grid=(2, nB, nT),
            in_specs=[
                pl.BlockSpec((bB, in_dim, tT), lambda p, b, t: (b, 0, t)),  # x
                rep((in_dim, 1)), rep((in_dim, 1)),                          # g0, be0
                rep((hidden, 1)), rep((hidden, 1)),                          # g1, be1
                rep((hidden, in_dim)),                                       # w0
            ],
            out_specs=(rep((in_dim, 1)), rep((in_dim, 1)),
                       rep((hidden, 1)), rep((hidden, 1))),
        ),
        compiler_params=cparams_seq,
    )
    scale0, shift0, scale1, shift1 = stats_fn(x, g0, be0, g1, be1, w0)

    # ---- pass 2: apply (fully parallel over (batch-block, time-tile)) -------
    flops_per_col = 2 * (hidden * in_dim
                         + out_dim * (hidden + c_pad_dim
                                      + (in_dim if use_shortcut else 0)))
    w_bytes = 2 * (w0.size + w1.size + wc.size + (ws.size if use_shortcut else 0))
    cost = pl.CostEstimate(
        flops=int(N * flops_per_col),
        transcendentals=0,
        bytes_accessed=int((x.size + c_in.size + B * out_dim * T) * itemsize
                           + w_bytes),
    )

    in_specs = [
        pl.BlockSpec((bB, in_dim, tT), lambda b, t: (b, 0, t)),      # x
        pl.BlockSpec((bB, c_pad_dim, tT), lambda b, t: (b, 0, t)),   # c
        rep((in_dim, 1)), rep((in_dim, 1)),                           # bn_0 affine
        rep((hidden, 1)), rep((hidden, 1)),                           # bn_1 affine
        rep((hidden, in_dim)),                                        # w0
        rep((out_dim, hidden)),                                       # w1
        rep((out_dim, c_pad_dim)),                                    # wc
        rep((out_dim, 1)),                                            # b1 + bc
    ]
    args = [x, c_in, scale0, shift0, scale1, shift1, w0, w1, wc, bf]
    if use_shortcut:
        in_specs.append(rep((out_dim, in_dim)))                       # ws
        args.append(ws)

    apply_fn = pl.pallas_call(
        functools.partial(_apply_kernel, use_shortcut, bB),
        out_shape=jax.ShapeDtypeStruct((B, out_dim, T), x.dtype),
        grid_spec=pltpu.PrefetchScalarGridSpec(
            num_scalar_prefetch=0,
            grid=(nB, nT),
            in_specs=in_specs,
            out_specs=pl.BlockSpec((bB, out_dim, tT), lambda b, t: (b, 0, t)),
        ),
        compiler_params=cparams_par,
        cost_estimate=cost,
    )
    return apply_fn(*args)


# ------------------------------ reference & test ------------------------------

def reference(x, c, p, use_shortcut):
    """Pure-JAX f32 reference mirroring the PyTorch module (training-mode BN)."""
    def bn(v, g, b):
        m = v.mean(axis=(0, 2), keepdims=True)
        var = ((v - m) ** 2).mean(axis=(0, 2), keepdims=True)
        return (v - m) / jnp.sqrt(var + EPS) * g.reshape(1, -1, 1) + b.reshape(1, -1, 1)

    def conv(v, w, b=None):  # w: (Cout, Cin)
        o = jnp.einsum("oc,bct->bot", w, v)
        if b is not None:
            o = o + b.reshape(1, -1, 1)
        return o

    h = jax.nn.relu(bn(x, p["g0"], p["be0"]))
    net = conv(h, p["w0"], p["b0"])
    h1 = jax.nn.relu(bn(net, p["g1"], p["be1"]))
    dx = conv(h1, p["w1"], p["b1"])
    xs = conv(x, p["ws"]) if use_shortcut else x
    return xs + dx + conv(c, p["wc"], p["bc"])


def _make_params(key, c_dim, in_dim, hidden, out_dim, zero_w1):
    ks = jax.random.split(key, 8)
    p = dict(
        g0=jnp.ones((in_dim,), jnp.float32),
        be0=jnp.zeros((in_dim,), jnp.float32),
        g1=jnp.ones((hidden,), jnp.float32),
        be1=jnp.zeros((hidden,), jnp.float32),
        w0=jax.random.normal(ks[0], (hidden, in_dim), jnp.float32) * 0.1,
        b0=jax.random.normal(ks[1], (hidden,), jnp.float32) * 0.1,
        w1=(jnp.zeros((out_dim, hidden), jnp.float32) if zero_w1
            else jax.random.normal(ks[2], (out_dim, hidden), jnp.float32) * 0.1),
        b1=jax.random.normal(ks[3], (out_dim,), jnp.float32) * 0.1,
        wc=jax.random.normal(ks[4], (out_dim, c_dim), jnp.float32) * 0.1,
        bc=jax.random.normal(ks[5], (out_dim,), jnp.float32) * 0.1,
    )
    if in_dim != out_dim:
        p["ws"] = jax.random.normal(ks[6], (out_dim, in_dim), jnp.float32) * 0.1
    return p


if __name__ == "__main__":
    key = jax.random.PRNGKey(0)
    k_x, k_c, k_p1, k_p2 = jax.random.split(key, 4)

    B, T = 2, 256
    c_dim, in_dim, hidden, out_dim = 4, 16, 32, 8

    x = jax.random.normal(k_x, (B, in_dim, T), jnp.float32)
    c = jax.random.normal(k_c, (B, c_dim, T), jnp.float32)

    # Case 1: in_dim != out_dim -> learned shortcut; fc_1 weight zero-init as in
    # the module's __init__.
    p1 = _make_params(k_p1, c_dim, in_dim, hidden, out_dim, zero_w1=True)
    out1 = resnet_block_conv1d(x, c, p1)
    jax.block_until_ready(out1)
    np.testing.assert_allclose(np.asarray(out1),
                               np.asarray(reference(x, c, p1, True)),
                               rtol=2e-2, atol=2e-2)

    # Case 2: in_dim == out_dim -> identity shortcut (no ws input); nonzero fc_1
    # weight so the bn_1 statistics path is exercised numerically.
    p2 = _make_params(k_p2, c_dim, in_dim, hidden, in_dim, zero_w1=False)
    out2 = resnet_block_conv1d(x, c, p2)
    jax.block_until_ready(out2)
    np.testing.assert_allclose(np.asarray(out2),
                               np.asarray(reference(x, c, p2, False)),
                               rtol=2e-2, atol=2e-2)

    print("KERNEL_OK")
</pallas_src>

<mosaic_0001>
module attributes {stable_mosaic.version = 11 : i64} {
  func.func @_stats_kernel(%arg0: i32, %arg1: i32, %arg2: i32, %arg3: memref<2x16x256xf32, #tpu.memory_space<vmem>>, %arg4: memref<16x1xf32, #tpu.memory_space<vmem>>, %arg5: memref<16x1xf32, #tpu.memory_space<vmem>>, %arg6: memref<32x1xf32, #tpu.memory_space<vmem>>, %arg7: memref<32x1xf32, #tpu.memory_space<vmem>>, %arg8: memref<32x16xbf16, #tpu.memory_space<vmem>>, %arg9: memref<16x1xf32, #tpu.memory_space<vmem>>, %arg10: memref<16x1xf32, #tpu.memory_space<vmem>>, %arg11: memref<32x1xf32, #tpu.memory_space<vmem>>, %arg12: memref<32x1xf32, #tpu.memory_space<vmem>>) attributes {dimension_semantics = [#tpu.dimension_semantics<arbitrary>, #tpu.dimension_semantics<arbitrary>, #tpu.dimension_semantics<arbitrary>], iteration_bounds = array<i64: 2, 1, 1>, scalar_prefetch = 0 : i64, scratch_operands = 0 : i64, tpu.core_type = #tpu.core_type<tc>, window_params = [{transform_indices = @transform_0, window_bounds = array<i64: 2, 16, 256>}, {pipeline_mode = #tpu.pipeline_mode<synchronous>, transform_indices = @transform_1, window_bounds = array<i64: 16, 1>}, {pipeline_mode = #tpu.pipeline_mode<synchronous>, transform_indices = @transform_2, window_bounds = array<i64: 16, 1>}, {pipeline_mode = #tpu.pipeline_mode<synchronous>, transform_indices = @transform_3, window_bounds = array<i64: 32, 1>}, {pipeline_mode = #tpu.pipeline_mode<synchronous>, transform_indices = @transform_4, window_bounds = array<i64: 32, 1>}, {pipeline_mode = #tpu.pipeline_mode<synchronous>, transform_indices = @transform_5, window_bounds = array<i64: 32, 16>}, {pipeline_mode = #tpu.pipeline_mode<synchronous>, transform_indices = @transform_6, window_bounds = array<i64: 16, 1>}, {pipeline_mode = #tpu.pipeline_mode<synchronous>, transform_indices = @transform_7, window_bounds = array<i64: 16, 1>}, {pipeline_mode = #tpu.pipeline_mode<synchronous>, transform_indices = @transform_8, window_bounds = array<i64: 32, 1>}, {pipeline_mode = #tpu.pipeline_mode<synchronous>, transform_indices = @transform_9, window_bounds = array<i64: 32, 1>}]} {
    %c0_i32 = arith.constant 0 : i32
    %0 = arith.cmpi eq, %arg1, %c0_i32 : i32
    %c0_i32_0 = arith.constant 0 : i32
    %1 = arith.cmpi eq, %arg2, %c0_i32_0 : i32
    %2 = arith.andi %0, %1 : i1
    %c0_i32_1 = arith.constant 0 : i32
    %3 = arith.cmpi eq, %arg0, %c0_i32_1 : i32
    %c0_i32_2 = arith.constant 0 : i32
    %4 = arith.cmpi eq, %arg1, %c0_i32_2 : i32
    %5 = arith.andi %3, %4 : i1
    %c0_i32_3 = arith.constant 0 : i32
    %6 = arith.cmpi eq, %arg2, %c0_i32_3 : i32
    %7 = arith.andi %5, %6 : i1
    %8 = arith.extui %7 : i1 to i32
    %c0_i32_4 = arith.constant 0 : i32
    %9 = arith.cmpi ne, %8, %c0_i32_4 : i32
    scf.if %9 {
      %cst = arith.constant 0.000000e+00 : f32
      %24 = vector.broadcast %cst : f32 to vector<16x1xf32>
      %c0 = arith.constant 0 : index
      %c0_12 = arith.constant 0 : index
      %25 = vector.load %arg9[%c0, %c0_12] : memref<16x1xf32, #tpu.memory_space<vmem>>, vector<16x1xf32>
      tpu.vector_store %arg9[%c0, %c0_12], %24 {strides = array<i32>} : memref<16x1xf32, #tpu.memory_space<vmem>>, vector<16x1xf32>,
      %cst_13 = arith.constant 0.000000e+00 : f32
      %26 = vector.broadcast %cst_13 : f32 to vector<16x1xf32>
      %c0_14 = arith.constant 0 : index
      %c0_15 = arith.constant 0 : index
      %27 = vector.load %arg10[%c0_14, %c0_15] : memref<16x1xf32, #tpu.memory_space<vmem>>, vector<16x1xf32>
      tpu.vector_store %arg10[%c0_14, %c0_15], %26 {strides = array<i32>} : memref<16x1xf32, #tpu.memory_space<vmem>>, vector<16x1xf32>,
      %cst_16 = arith.constant 0.000000e+00 : f32
      %28 = vector.broadcast %cst_16 : f32 to vector<32x1xf32>
      %c0_17 = arith.constant 0 : index
      %c0_18 = arith.constant 0 : index
      %29 = vector.load %arg11[%c0_17, %c0_18] : memref<32x1xf32, #tpu.memory_space<vmem>>, vector<32x1xf32>
      tpu.vector_store %arg11[%c0_17, %c0_18], %28 {strides = array<i32>} : memref<32x1xf32, #tpu.memory_space<vmem>>, vector<32x1xf32>,
      %cst_19 = arith.constant 0.000000e+00 : f32
      %30 = vector.broadcast %cst_19 : f32 to vector<32x1xf32>
      %c0_20 = arith.constant 0 : index
      %c0_21 = arith.constant 0 : index
      %31 = vector.load %arg12[%c0_20, %c0_21] : memref<32x1xf32, #tpu.memory_space<vmem>>, vector<32x1xf32>
      tpu.vector_store %arg12[%c0_20, %c0_21], %30 {strides = array<i32>} : memref<32x1xf32, #tpu.memory_space<vmem>>, vector<32x1xf32>,
    } else {
    }
    %c0_i32_5 = arith.constant 0 : i32
    %10 = arith.cmpi eq, %arg0, %c0_i32_5 : i32
    %11 = arith.extui %10 : i1 to i32
    %c0_i32_6 = arith.constant 0 : i32
    %12 = arith.cmpi ne, %11, %c0_i32_6 : i32
    scf.if %12 {
      %c0_i32_12 = arith.constant 0 : i32
      %c2_i32 = arith.constant 2 : i32
      %24 = arith.addi %c0_i32_12, %c2_i32 : i32
      %c1_i32_13 = arith.constant 1 : i32
      scf.for %arg13 = %c0_i32_12 to %24 step %c1_i32_13  : i32 {
        %c1_i32_15 = arith.constant 1 : i32
        %25 = arith.muli %arg13, %c1_i32_15 : i32
        %c0_i32_16 = arith.constant 0 : i32
        %26 = arith.addi %c0_i32_16, %25 : i32
        %27 = arith.index_cast %26 : i32 to index
        %c0 = arith.constant 0 : index
        %c0_17 = arith.constant 0 : index
        %28 = vector.load %arg3[%27, %c0, %c0_17] : memref<2x16x256xf32, #tpu.memory_space<vmem>>, vector<1x16x256xf32>
        %29 = vector.shape_cast %28 : vector<1x16x256xf32> to vector<16x256xf32>
        %c0_18 = arith.constant 0 : index
        %c0_19 = arith.constant 0 : index
        %30 = vector.load %arg9[%c0_18, %c0_19] : memref<16x1xf32, #tpu.memory_space<vmem>>, vector<16x1xf32>
        %cst = arith.constant dense<0.000000e+00> : vector<16xf32>
        %31 = vector.multi_reduction <add>, %29, %cst [1] : vector<16x256xf32> to vector<16xf32>
        %32 = vector.shape_cast %31 : vector<16xf32> to vector<16x1xf32>
        %33 = arith.addf %30, %32 : vector<16x1xf32>
        %c0_20 = arith.constant 0 : index
        %c0_21 = arith.constant 0 : index
        %34 = vector.load %arg9[%c0_20, %c0_21] : memref<16x1xf32, #tpu.memory_space<vmem>>, vector<16x1xf32>
        tpu.vector_store %arg9[%c0_20, %c0_21], %33 {strides = array<i32>} : memref<16x1xf32, #tpu.memory_space<vmem>>, vector<16x1xf32>,
        %c0_22 = arith.constant 0 : index
        %c0_23 = arith.constant 0 : index
        %35 = vector.load %arg10[%c0_22, %c0_23] : memref<16x1xf32, #tpu.memory_space<vmem>>, vector<16x1xf32>
        %36 = arith.mulf %29, %29 : vector<16x256xf32>
        %cst_24 = arith.constant dense<0.000000e+00> : vector<16xf32>
        %37 = vector.multi_reduction <add>, %36, %cst_24 [1] : vector<16x256xf32> to vector<16xf32>
        %38 = vector.shape_cast %37 : vector<16xf32> to vector<16x1xf32>
        %39 = arith.addf %35, %38 : vector<16x1xf32>
        %c0_25 = arith.constant 0 : index
        %c0_26 = arith.constant 0 : index
        %40 = vector.load %arg10[%c0_25, %c0_26] : memref<16x1xf32, #tpu.memory_space<vmem>>, vector<16x1xf32>
        tpu.vector_store %arg10[%c0_25, %c0_26], %39 {strides = array<i32>} : memref<16x1xf32, #tpu.memory_space<vmem>>, vector<16x1xf32>,
      }
      %c2_i32_14 = arith.constant 2 : i32
    } else {
    }
    %c0_i32_7 = arith.constant 0 : i32
    %13 = arith.cmpi eq, %arg0, %c0_i32_7 : i32
    %14 = arith.andi %13, %2 : i1
    %15 = arith.extui %14 : i1 to i32
    %c0_i32_8 = arith.constant 0 : i32
    %16 = arith.cmpi ne, %15, %c0_i32_8 : i32
    scf.if %16 {
      %c0 = arith.constant 0 : index
      %c0_12 = arith.constant 0 : index
      %24 = vector.load %arg9[%c0, %c0_12] : memref<16x1xf32, #tpu.memory_space<vmem>>, vector<16x1xf32>
      %cst = arith.constant 0.001953125 : f32
      %25 = vector.broadcast %cst : f32 to vector<16x1xf32>
      %26 = arith.mulf %24, %25 : vector<16x1xf32>
      %c0_13 = arith.constant 0 : index
      %c0_14 = arith.constant 0 : index
      %27 = vector.load %arg10[%c0_13, %c0_14] : memref<16x1xf32, #tpu.memory_space<vmem>>, vector<16x1xf32>
      %cst_15 = arith.constant 0.001953125 : f32
      %28 = vector.broadcast %cst_15 : f32 to vector<16x1xf32>
      %29 = arith.mulf %27, %28 : vector<16x1xf32>
      %30 = arith.mulf %26, %26 : vector<16x1xf32>
      %31 = arith.subf %29, %30 : vector<16x1xf32>
      %c0_16 = arith.constant 0 : index
      %c0_17 = arith.constant 0 : index
      %32 = vector.load %arg4[%c0_16, %c0_17] : memref<16x1xf32, #tpu.memory_space<vmem>>, vector<16x1xf32>
      %cst_18 = arith.constant 9.99999974E-6 : f32
      %33 = vector.broadcast %cst_18 : f32 to vector<16x1xf32>
      %34 = arith.addf %31, %33 : vector<16x1xf32>
      %35 = math.rsqrt %34 : vector<16x1xf32>
      %36 = arith.mulf %32, %35 : vector<16x1xf32>
      %c0_19 = arith.constant 0 : index
      %c0_20 = arith.constant 0 : index
      %37 = vector.load %arg9[%c0_19, %c0_20] : memref<16x1xf32, #tpu.memory_space<vmem>>, vector<16x1xf32>
      tpu.vector_store %arg9[%c0_19, %c0_20], %36 {strides = array<i32>} : memref<16x1xf32, #tpu.memory_space<vmem>>, vector<16x1xf32>,
      %c0_21 = arith.constant 0 : index
      %c0_22 = arith.constant 0 : index
      %38 = vector.load %arg5[%c0_21, %c0_22] : memref<16x1xf32, #tpu.memory_space<vmem>>, vector<16x1xf32>
      %39 = arith.mulf %26, %36 : vector<16x1xf32>
      %40 = arith.subf %38, %39 : vector<16x1xf32>
      %c0_23 = arith.constant 0 : index
      %c0_24 = arith.constant 0 : index
      %41 = vector.load %arg10[%c0_23, %c0_24] : memref<16x1xf32, #tpu.memory_space<vmem>>, vector<16x1xf32>
      tpu.vector_store %arg10[%c0_23, %c0_24], %40 {strides = array<i32>} : memref<16x1xf32, #tpu.memory_space<vmem>>, vector<16x1xf32>,
    } else {
    }
    %c1_i32 = arith.constant 1 : i32
    %17 = arith.cmpi eq, %arg0, %c1_i32 : i32
    %18 = arith.extui %17 : i1 to i32
    %c0_i32_9 = arith.constant 0 : i32
    %19 = arith.cmpi ne, %18, %c0_i32_9 : i32
    scf.if %19 {
      %c0_i32_12 = arith.constant 0 : i32
      %c2_i32 = arith.constant 2 : i32
      %24 = arith.addi %c0_i32_12, %c2_i32 : i32
      %c1_i32_13 = arith.constant 1 : i32
      scf.for %arg13 = %c0_i32_12 to %24 step %c1_i32_13  : i32 {
        %c1_i32_15 = arith.constant 1 : i32
        %25 = arith.muli %arg13, %c1_i32_15 : i32
        %c0_i32_16 = arith.constant 0 : i32
        %26 = arith.addi %c0_i32_16, %25 : i32
        %27 = arith.index_cast %26 : i32 to index
        %c0 = arith.constant 0 : index
        %c0_17 = arith.constant 0 : index
        %28 = vector.load %arg3[%27, %c0, %c0_17] : memref<2x16x256xf32, #tpu.memory_space<vmem>>, vector<1x16x256xf32>
        %29 = vector.shape_cast %28 : vector<1x16x256xf32> to vector<16x256xf32>
        %c0_18 = arith.constant 0 : index
        %c0_19 = arith.constant 0 : index
        %30 = vector.load %arg9[%c0_18, %c0_19] : memref<16x1xf32, #tpu.memory_space<vmem>>, vector<16x1xf32>
        %31 = vector.broadcast %30 : vector<16x1xf32> to vector<16x256xf32>
        %32 = arith.mulf %29, %31 : vector<16x256xf32>
        %c0_20 = arith.constant 0 : index
        %c0_21 = arith.constant 0 : index
        %33 = vector.load %arg10[%c0_20, %c0_21] : memref<16x1xf32, #tpu.memory_space<vmem>>, vector<16x1xf32>
        %34 = vector.broadcast %33 : vector<16x1xf32> to vector<16x256xf32>
        %35 = arith.addf %32, %34 : vector<16x256xf32>
        %cst = arith.constant 0.000000e+00 : f32
        %36 = vector.broadcast %cst : f32 to vector<16x256xf32>
        %37 = arith.maximumf %35, %36 : vector<16x256xf32>
        %c0_22 = arith.constant 0 : index
        %c0_23 = arith.constant 0 : index
        %38 = vector.load %arg8[%c0_22, %c0_23] : memref<32x16xbf16, #tpu.memory_space<vmem>>, vector<32x16xbf16>
        %39 = arith.truncf %37 : vector<16x256xf32> to vector<16x256xbf16>
        %cst_24 = arith.constant dense<0.000000e+00> : vector<32x256xf32>
        %40 = tpu.matmul %38, %39, %cst_24 {dimension_numbers = #tpu.dot_dimension_numbers<[1], [0], [0], [1], [0, 0, 1, 1], [], []>} : vector<32x16xbf16>, vector<16x256xbf16>, vector<32x256xf32> -> vector<32x256xf32>
        %c0_25 = arith.constant 0 : index
        %c0_26 = arith.constant 0 : index
        %41 = vector.load %arg11[%c0_25, %c0_26] : memref<32x1xf32, #tpu.memory_space<vmem>>, vector<32x1xf32>
        %cst_27 = arith.constant dense<0.000000e+00> : vector<32xf32>
        %42 = vector.multi_reduction <add>, %40, %cst_27 [1] : vector<32x256xf32> to vector<32xf32>
        %43 = vector.shape_cast %42 : vector<32xf32> to vector<32x1xf32>
        %44 = arith.addf %41, %43 : vector<32x1xf32>
        %c0_28 = arith.constant 0 : index
        %c0_29 = arith.constant 0 : index
        %45 = vector.load %arg11[%c0_28, %c0_29] : memref<32x1xf32, #tpu.memory_space<vmem>>, vector<32x1xf32>
        tpu.vector_store %arg11[%c0_28, %c0_29], %44 {strides = array<i32>} : memref<32x1xf32, #tpu.memory_space<vmem>>, vector<32x1xf32>,
        %c0_30 = arith.constant 0 : index
        %c0_31 = arith.constant 0 : index
        %46 = vector.load %arg12[%c0_30, %c0_31] : memref<32x1xf32, #tpu.memory_space<vmem>>, vector<32x1xf32>
        %47 = arith.mulf %40, %40 : vector<32x256xf32>
        %cst_32 = arith.constant dense<0.000000e+00> : vector<32xf32>
        %48 = vector.multi_reduction <add>, %47, %cst_32 [1] : vector<32x256xf32> to vector<32xf32>
        %49 = vector.shape_cast %48 : vector<32xf32> to vector<32x1xf32>
        %50 = arith.addf %46, %49 : vector<32x1xf32>
        %c0_33 = arith.constant 0 : index
        %c0_34 = arith.constant 0 : index
        %51 = vector.load %arg12[%c0_33, %c0_34] : memref<32x1xf32, #tpu.memory_space<vmem>>, vector<32x1xf32>
        tpu.vector_store %arg12[%c0_33, %c0_34], %50 {strides = array<i32>} : memref<32x1xf32, #tpu.memory_space<vmem>>, vector<32x1xf32>,
      }
      %c2_i32_14 = arith.constant 2 : i32
    } else {
    }
    %c1_i32_10 = arith.constant 1 : i32
    %20 = arith.cmpi eq, %arg0, %c1_i32_10 : i32
    %21 = arith.andi %20, %2 : i1
    %22 = arith.extui %21 : i1 to i32
    %c0_i32_11 = arith.constant 0 : i32
    %23 = arith.cmpi ne, %22, %c0_i32_11 : i32
    scf.if %23 {
      %c0 = arith.constant 0 : index
      %c0_12 = arith.constant 0 : index
      %24 = vector.load %arg11[%c0, %c0_12] : memref<32x1xf32, #tpu.memory_space<vmem>>, vector<32x1xf32>
      %cst = arith.constant 0.001953125 : f32
      %25 = vector.broadcast %cst : f32 to vector<32x1xf32>
      %26 = arith.mulf %24, %25 : vector<32x1xf32>
      %c0_13 = arith.constant 0 : index
      %c0_14 = arith.constant 0 : index
      %27 = vector.load %arg12[%c0_13, %c0_14] : memref<32x1xf32, #tpu.memory_space<vmem>>, vector<32x1xf32>
      %cst_15 = arith.constant 0.001953125 : f32
      %28 = vector.broadcast %cst_15 : f32 to vector<32x1xf32>
      %29 = arith.mulf %27, %28 : vector<32x1xf32>
      %30 = arith.mulf %26, %26 : vector<32x1xf32>
      %31 = arith.subf %29, %30 : vector<32x1xf32>
      %c0_16 = arith.constant 0 : index
      %c0_17 = arith.constant 0 : index
      %32 = vector.load %arg6[%c0_16, %c0_17] : memref<32x1xf32, #tpu.memory_space<vmem>>, vector<32x1xf32>
      %cst_18 = arith.constant 9.99999974E-6 : f32
      %33 = vector.broadcast %cst_18 : f32 to vector<32x1xf32>
      %34 = arith.addf %31, %33 : vector<32x1xf32>
      %35 = math.rsqrt %34 : vector<32x1xf32>
      %36 = arith.mulf %32, %35 : vector<32x1xf32>
      %c0_19 = arith.constant 0 : index
      %c0_20 = arith.constant 0 : index
      %37 = vector.load %arg11[%c0_19, %c0_20] : memref<32x1xf32, #tpu.memory_space<vmem>>, vector<32x1xf32>
      tpu.vector_store %arg11[%c0_19, %c0_20], %36 {strides = array<i32>} : memref<32x1xf32, #tpu.memory_space<vmem>>, vector<32x1xf32>,
      %c0_21 = arith.constant 0 : index
      %c0_22 = arith.constant 0 : index
      %38 = vector.load %arg7[%c0_21, %c0_22] : memref<32x1xf32, #tpu.memory_space<vmem>>, vector<32x1xf32>
      %39 = arith.mulf %26, %36 : vector<32x1xf32>
      %40 = arith.subf %38, %39 : vector<32x1xf32>
      %c0_23 = arith.constant 0 : index
      %c0_24 = arith.constant 0 : index
      %41 = vector.load %arg12[%c0_23, %c0_24] : memref<32x1xf32, #tpu.memory_space<vmem>>, vector<32x1xf32>
      tpu.vector_store %arg12[%c0_23, %c0_24], %40 {strides = array<i32>} : memref<32x1xf32, #tpu.memory_space<vmem>>, vector<32x1xf32>,
    } else {
    }
    return
  }
  func.func @transform_0(%arg0: i32, %arg1: i32, %arg2: i32) -> (i32, i32, i32) {
    %c0_i32 = arith.constant 0 : i32
    %c0_i32_0 = arith.constant 0 : i32
    return %arg1, %c0_i32, %arg2 : i32, i32, i32
  }
  func.func @transform_1(%arg0: i32, %arg1: i32, %arg2: i32) -> (i32, i32) {
    %c0_i32 = arith.constant 0 : i32
    %c0_i32_0 = arith.constant 0 : i32
    %c0_i32_1 = arith.constant 0 : i32
    return %c0_i32, %c0_i32_0 : i32, i32
  }
  func.func @transform_2(%arg0: i32, %arg1: i32, %arg2: i32) -> (i32, i32) {
    %c0_i32 = arith.constant 0 : i32
    %c0_i32_0 = arith.constant 0 : i32
    %c0_i32_1 = arith.constant 0 : i32
    return %c0_i32, %c0_i32_0 : i32, i32
  }
  func.func @transform_3(%arg0: i32, %arg1: i32, %arg2: i32) -> (i32, i32) {
    %c0_i32 = arith.constant 0 : i32
    %c0_i32_0 = arith.constant 0 : i32
    %c0_i32_1 = arith.constant 0 : i32
    return %c0_i32, %c0_i32_0 : i32, i32
  }
  func.func @transform_4(%arg0: i32, %arg1: i32, %arg2: i32) -> (i32, i32) {
    %c0_i32 = arith.constant 0 : i32
    %c0_i32_0 = arith.constant 0 : i32
    %c0_i32_1 = arith.constant 0 : i32
    return %c0_i32, %c0_i32_0 : i32, i32
  }
  func.func @transform_5(%arg0: i32, %arg1: i32, %arg2: i32) -> (i32, i32) {
    %c0_i32 = arith.constant 0 : i32
    %c0_i32_0 = arith.constant 0 : i32
    %c0_i32_1 = arith.constant 0 : i32
    return %c0_i32, %c0_i32_0 : i32, i32
  }
  func.func @transform_6(%arg0: i32, %arg1: i32, %arg2: i32) -> (i32, i32) {
    %c0_i32 = arith.constant 0 : i32
    %c0_i32_0 = arith.constant 0 : i32
    %c0_i32_1 = arith.constant 0 : i32
    return %c0_i32, %c0_i32_0 : i32, i32
  }
  func.func @transform_7(%arg0: i32, %arg1: i32, %arg2: i32) -> (i32, i32) {
    %c0_i32 = arith.constant 0 : i32
    %c0_i32_0 = arith.constant 0 : i32
    %c0_i32_1 = arith.constant 0 : i32
    return %c0_i32, %c0_i32_0 : i32, i32
  }
  func.func @transform_8(%arg0: i32, %arg1: i32, %arg2: i32) -> (i32, i32) {
    %c0_i32 = arith.constant 0 : i32
    %c0_i32_0 = arith.constant 0 : i32
    %c0_i32_1 = arith.constant 0 : i32
    return %c0_i32, %c0_i32_0 : i32, i32
  }
  func.func @transform_9(%arg0: i32, %arg1: i32, %arg2: i32) -> (i32, i32) {
    %c0_i32 = arith.constant 0 : i32
    %c0_i32_0 = arith.constant 0 : i32
    %c0_i32_1 = arith.constant 0 : i32
    return %c0_i32, %c0_i32_0 : i32, i32
  }
}

</mosaic_0001>

<bundles_post_ra>
// kernel: tpu_custom_call.1
= control target key start
LH: loop header
LB: loop body
LE: loop exit
PB: predicated region body
PF: predicated region fallthrough
CT: control target
= control target key end

     0   :  { %s965_s30 = smov 0   ;;  %s967_s10 = smov 0   ;;  %s1278_s0 = inlined_call_operand.vmem [shape: f32[2,16,256], index: 0, kind: input, shape index: {}]   ;;  %s1279_s1 = inlined_call_operand.vmem [shape: f32[16,1], index: 1, kind: input, shape index: {}]   ;;  %s1280_s2 = inlined_call_operand.vmem [shape: f32[16,1], index: 2, kind: input, shape index: {}]   ;;  %s1281_s3 = inlined_call_operand.vmem [shape: f32[32,1], index: 3, kind: input, shape index: {}]   ;;  %s1282_s4 = inlined_call_operand.vmem [shape: f32[32,1], index: 4, kind: input, shape index: {}]   ;;  %s1283_s5 = inlined_call_operand.vmem [shape: bf16[32,16], index: 5, kind: input, shape index: {}]   ;;  %s1284_s6 = inlined_call_operand.vmem [shape: f32[16,1], index: 6, kind: output, shape index: {0}]   ;;  %s1285_s7 = inlined_call_operand.vmem [shape: f32[16,1], index: 7, kind: output, shape index: {1}]   ;;  %s1286_s8 = inlined_call_operand.vmem [shape: f32[32,1], index: 8, kind: output, shape index: {2}]   ;;  %s1287_s9 = inlined_call_operand.vmem [shape: f32[32,1], index: 9, kind: output, shape index: {3}]  }
   0x1   :  { %s969_s11 = smov 0  }
   0x2 LB: > { %s39_s12 = sadd.s32 1, %s899_s10  ;;  %p790_p0 = scmp.ge.s32.totalorder %s903_s11, 1  ;;  %s903_s11 = sphi %s969_s11, %s20_s11   ;;  %s899_s10 = sphi %s967_s10, %s1289_s10   ;;  %s895_s30 = sphi %s965_s30, %s1288_s30  }
   0x3   : > { %p41_p1 = scmp.ge.s32.totalorder %s39_s12, 2  ;;  %p302_p2 = scmp.lt.s32.totalorder %s903_s11, 3 }
   0x5   : > { %s1291_s12 = smov (%p41_p1, %s39_s12), 0  ;;  %p303_p3 = pnand %p790_p0, %p302_p2 }
   0x6   : > { %p355_p4 = scmp.eq.s32.totalorder (!%p303_p3), %s895_s30, 0 }
   0x7   : > { %306 = sbr.rel (%p303_p3) target bundleno = 781 (0x30d), region = 44 }
   0xe   : > { %361 = sbr.rel (!%p355_p4) target bundleno = 21 (0x15), region = 48  ;;  %vm362_vm0 = vcmask (%p355_p4), 7168   ;;  %v913_v0 = vmov (%p355_p4), 0.0  }
   0xf   : > { %363 = vst.msk [vmem:[%s1284_s6] sm:$0xff] (%p355_p4), %vm362_vm0, %v913_v0  ;;  %364 = vst.msk [vmem:[%s1284_s6 + $0x8] sm:$0xff] (%p355_p4), %vm362_vm0, %v913_v0 }
  0x10   : > { %365 = vst.msk [vmem:[%s1285_s7] sm:$0xff] (%p355_p4), %vm362_vm0, %v913_v0  ;;  %366 = vst.msk [vmem:[%s1285_s7 + $0x8] sm:$0xff] (%p355_p4), %vm362_vm0, %v913_v0 }
  0x11   : > { %367 = vst.msk [vmem:[%s1286_s8] sm:$0xff] (%p355_p4), %vm362_vm0, %v913_v0  ;;  %368 = vst.msk [vmem:[%s1286_s8 + $0x8] sm:$0xff] (%p355_p4), %vm362_vm0, %v913_v0 }
  0x12   : > { %369 = vst.msk [vmem:[%s1286_s8 + $0x10] sm:$0xff] (%p355_p4), %vm362_vm0, %v913_v0  ;;  %370 = vst.msk [vmem:[%s1286_s8 + $0x18] sm:$0xff] (%p355_p4), %vm362_vm0, %v913_v0 }
  0x13   : > { %371 = vst.msk [vmem:[%s1287_s9] sm:$0xff] (%p355_p4), %vm362_vm0, %v913_v0  ;;  %372 = vst.msk [vmem:[%s1287_s9 + $0x8] sm:$0xff] (%p355_p4), %vm362_vm0, %v913_v0 }
  0x14   : > { %373 = vst.msk [vmem:[%s1287_s9 + $0x10] sm:$0xff] (%p355_p4), %vm362_vm0, %v913_v0  ;;  %374 = vst.msk [vmem:[%s1287_s9 + $0x18] sm:$0xff] (%p355_p4), %vm362_vm0, %v913_v0 }
  0x15 PF: > { %p793_p5 = scmp.ne.s32.totalorder %s895_s30, 0 }
  0x16   : > { %s1025_s20 = smov (!%p793_p5), 0  }
  0x17   : > { %377 = sbr.rel (%p793_p5) target bundleno = 191 (0xbf), region = 52 }
  0x1e LB: >> { %s809_s21 = sshll.u32 %s907_s20, 5  ;;  %v391_v13 = vld [vmem:[%s1284_s6] sm:$0xff]  ;;  %vm401_vm1 = vcmask 7168   ;;  %v392_v18 = vld [vmem:[%s1284_s6 + $0x8] sm:$0xff]  ;;  %s383_s20 = sadd.s32 1, %s907_s20   ;;  %s907_s20 = sphi %s1025_s20, %s383_s20  }
  0x1f   : >> { %s386_s24 = scalar_lea.vmem %s1278_s0, %s809_s21  ;;  %v404_v14 = vld [vmem:[%s1285_s7] sm:$0xff]  ;;  %v405_v20 = vld [vmem:[%s1285_s7 + $0x8] sm:$0xff]  ;;  %p380_p6 = scmp.ge.s32.totalorder %s383_s20, 2  }
  0x20   : >> { %v387_v1 = vld [vmem:[%s386_s24] sm:$0xff]  ;;  %v388_v2 = vld [vmem:[%s386_s24 + $0x8] sm:$0xff]  ;;  %v389_v3 = vld [vmem:[%s386_s24 + $0x10] sm:$0xff] }
  0x21   : >> { %v406_v4 = vmul.f32 %v387_v1, %v387_v1  ;;  %v407_v5 = vmul.f32 %v388_v2, %v388_v2  ;;  %v393_v6 = vadd.f32 %v388_v2, %v387_v1  ;;  %v390_v7 = vld [vmem:[%s386_s24 + $0x18] sm:$0xff]  ;;  %v408_v8 = vmul.f32 %v389_v3, %v389_v3 }
  0x22   : >> { %v409_v9 = vmul.f32 %v390_v7, %v390_v7  ;;  %v396_v11 = vadd.f32 %v390_v7, %v389_v3 }
  0x23   : >> { %v410_v10 = vadd.f32 %v407_v5, %v406_v4  ;;  %394 = vadd.xlane.f32.xlu0 %v393_v6 }
  0x24   : >> { %v413_v12 = vadd.f32 %v409_v9, %v408_v8 }
  0x25   : >> { %411 = vadd.xlane.f32.xlu1 %v410_v10 }
  0x27   : >> { %397 = vadd.xlane.f32.xlu0 %v396_v11 }
  0x29   : >> { %414 = vadd.xlane.f32.xlu1 %v413_v12 }
  0xb0   : >> { %v395_v15 = vpop.xlane.xlu0 %394 }
  0xb1   : >> { %v399_v16 = vadd.f32 %v395_v15, %v391_v13 }
  0xb2   : >> { %v412_v17 = vpop.xlane.xlu1 %411 }
  0xb3   : >> { %v416_v19 = vadd.f32 %v412_v17, %v404_v14  ;;  %402 = vst.msk [vmem:[%s1284_s6] sm:$0xff] %vm401_vm1, %v399_v16 }
  0xb4   : >> { %v398_v21 = vpop.xlane.xlu0 %397 }
  0xb5   : >> { %418 = vst.msk [vmem:[%s1285_s7] sm:$0xff] %vm401_vm1, %v416_v19  ;;  %v400_v22 = vadd.f32 %v398_v21, %v392_v18 }
  0xb6   : >> { %v415_v23 = vpop.xlane.xlu1 %414 }
  0xb7   : >> { %v417_v24 = vadd.f32 %v415_v23, %v405_v20  ;;  %403 = vst.msk [vmem:[%s1284_s6 + $0x8] sm:$0xff] %vm401_vm1, %v400_v22 }
  0xb8   : > { %382 = sbr.rel (!%p380_p6) target bundleno = 30 (0x1e), region = 130 }
  0xb9   : >> { %419 = vst.msk [vmem:[%s1285_s7 + $0x8] sm:$0xff] %vm401_vm1, %v417_v24 }
  0xbf PF: > { %423 = sbr.rel (!%p355_p4) target bundleno = 219 (0xdb), region = 63  ;;  %v424_v25 = vld [vmem:[%s1284_s6] sm:$0xff] (%p355_p4)  ;;  %v425_v29 = vld [vmem:[%s1284_s6 + $0x8] sm:$0xff] (%p355_p4)  ;;  %vm444_vm2 = vcmask (%p355_p4), 7168  }
  0xc0   : > { %v428_v26 = vld [vmem:[%s1285_s7] sm:$0xff] (%p355_p4)  ;;  %v426_v27 = vmul.f32 (%p355_p4), 0.001953125, %v424_v25  ;;  %v429_v30 = vld [vmem:[%s1285_s7 + $0x8] sm:$0xff] (%p355_p4)  ;;  %v427_v31 = vmul.f32 (%p355_p4), 0.001953125, %v425_v29 }
  0xc1   : > { %v430_v28 = vmul.f32 (%p355_p4), 0.001953125, %v428_v26  ;;  %v431_v32 = vmul.f32 (%p355_p4), 0.001953125, %v429_v30  ;;  %v436_v39 = vld [vmem:[%s1279_s1] sm:$0xff] (%p355_p4)  ;;  %v437_v40 = vld [vmem:[%s1279_s1 + $0x8] sm:$0xff] (%p355_p4) }
  0xc2   : > { %v432_v33 = vmul.f32 (%p355_p4), %v426_v27, %v426_v27  ;;  %v433_v34 = vmul.f32 (%p355_p4), %v427_v31, %v427_v31  ;;  %v447_v45 = vld [vmem:[%s1280_s2] sm:$0xff] (%p355_p4)  ;;  %v448_v47 = vld [vmem:[%s1280_s2 + $0x8] sm:$0xff] (%p355_p4) }
  0xc4   : > { %v434_v35 = vsub.f32 (%p355_p4), %v430_v28, %v432_v33  ;;  %v435_v36 = vsub.f32 (%p355_p4), %v431_v32, %v433_v34 }
  0xc6   : > { %v438_v37 = vadd.f32 1e-05, %v434_v35  ;;  %v439_v38 = vadd.f32 1e-05, %v435_v36 }
  0xc8   : > { %857 = vrsqrt.f32 %v438_v37 }
  0xc9   : > { %859 = vrsqrt.f32 %v439_v38 }
  0xd2   : > { %v858_v41 = vpop.eup %857 }
  0xd3   : > { %v860_v42 = vpop.eup %859  ;;  %v442_v43 = vmul.f32 %v858_v41, %v436_v39 }
  0xd4   : > { %v443_v44 = vmul.f32 %v860_v42, %v437_v40 }
  0xd5   : > { %445 = vst.msk [vmem:[%s1284_s6] sm:$0xff] %vm444_vm2, %v442_v43  ;;  %v449_v46 = vmul.f32 %v442_v43, %v426_v27 }
  0xd6   : > { %446 = vst.msk [vmem:[%s1284_s6 + $0x8] sm:$0xff] %vm444_vm2, %v443_v44  ;;  %v450_v48 = vmul.f32 %v443_v44, %v427_v31 }
  0xd7   : > { %v451_v49 = vsub.f32 %v447_v45, %v449_v46 }
  0xd8   : > { %v452_v50 = vsub.f32 %v448_v47, %v450_v48 }
  0xd9   : > { %453 = vst.msk [vmem:[%s1285_s7] sm:$0xff] %vm444_vm2, %v451_v49 }
  0xda   : > { %454 = vst.msk [vmem:[%s1285_s7 + $0x8] sm:$0xff] %vm444_vm2, %v452_v50 }
  0xdb PF: > { %p455_p7 = scmp.eq.s32.totalorder %s895_s30, 1  ;;  %p797_p8 = scmp.ne.s32.totalorder %s895_s30, 1 }
  0xdc   : > { %s1101_s14 = smov (!%p797_p8), 0  }
  0xdd   : > { %458 = sbr.rel (%p797_p8) target bundleno = 750 (0x2ee), region = 67 }
  0xe4 LB: >> { %v488_v51 = vld [vmem:[%s1285_s7] sm:$0xff]  ;;  %v914_v53 = vmov 0   ;;  %v489_v54 = vld [vmem:[%s1285_s7 + $0x8] sm:$0xff]  ;;  %s811_s24 = sshll.u32 %s911_s14, 5  ;;  %vm524_vm3 = vcmask 130048   ;;  %vm604_vm4 = vcmask 7168   ;;  %s911_s14 = sphi %s1101_s14, %s464_s14  }
  0xe5   : >> { %v472_v52 = vld [vmem:[%s1284_s6] sm:$0xff]  ;;  %862 = vset.pattern.permute.xlu1 %v914_v53  ;;  %861 = vset.pattern.permute.xlu0 %v914_v53  ;;  %v473_v55 = vld [vmem:[%s1284_s6 + $0x8] sm:$0xff]  ;;  %s467_s27 = scalar_lea.vmem %s1278_s0, %s811_s24  ;;  %v586_v45 = vld [vmem:[%s1286_s8 + $0x10] sm:$0xff]  ;;  %s464_s14 = sadd.s32 1, %s911_s14  }
  0xe6   : >> { %492 = vperm.xlu1 %862, %v488_v51   ;;  %476 = vperm.xlu0 %861, %v472_v52   ;;  %v468_v56 = vld [vmem:[%s467_s27] sm:$0xff]  ;;  %v469_v57 = vld [vmem:[%s467_s27 + $0x8] sm:$0xff]  ;;  %v470_v62 = vld [vmem:[%s467_s27 + $0x10] sm:$0xff]  ;;  %p461_p9 = scmp.ge.s32.totalorder %s464_s14, 2  }
  0xe7   : >> { %563 = vmatprep.mubr.bf16.mxu0 %v914_v53  ;;  %573 = vmatprep.mubr.bf16.mxu1 %v914_v53  ;;  %v471_v63 = vld [vmem:[%s467_s27 + $0x18] sm:$0xff]  ;;  %v863_v14 = vld [vmem:[%s1283_s5] sm:$0xff]   ;;  %v864_v15 = vld [vmem:[%s1283_s5 + $0x8] sm:$0xff]  }
  0xe8   : >> { %v584_v40 = vld [vmem:[%s1286_s8] sm:$0xff]  ;;  %v585_v42 = vld [vmem:[%s1286_s8 + $0x8] sm:$0xff]  ;;  %v587_v51 = vld [vmem:[%s1286_s8 + $0x18] sm:$0xff] }
  0xe9   : >> { %v609_v48 = vld [vmem:[%s1287_s9] sm:$0xff] }
  0xea   : >> { %497 = vperm.xlu1 %862, %v489_v54   ;;  %481 = vperm.xlu0 %861, %v473_v55   ;;  %v611_v54 = vld [vmem:[%s1287_s9 + $0x10] sm:$0xff] }
 0x165   : >> { %v493_v58 = vpop.permute.xlu1 %492  ;;  %v477_v59 = vpop.permute.xlu0 %476 }
 0x166   : >> { %v484_v60 = vmul.f32 %v477_v59, %v468_v56  ;;  %v485_v61 = vmul.f32 %v477_v59, %v469_v57  ;;  %v610_v57 = vld [vmem:[%s1287_s9 + $0x8] sm:$0xff] }
 0x168   : >> { %v500_v1 = vadd.f32 %v493_v58, %v484_v60  ;;  %v501_v2 = vadd.f32 %v493_v58, %v485_v61  ;;  %v612_v61 = vld [vmem:[%s1287_s9 + $0x18] sm:$0xff] }
 0x169   : >> { %v482_v0 = vpop.permute.xlu0 %481  ;;  %v498_v5 = vpop.permute.xlu1 %497 }
 0x16a   : >> { %v486_v3 = vmul.f32 %v482_v0, %v470_v62  ;;  %v487_v4 = vmul.f32 %v482_v0, %v471_v63  ;;  %v505_v8 = vmax.f32 %v501_v2, 0.0  ;;  %v504_v10 = vmax.f32 %v500_v1, 0.0 }
 0x16c   : >> { %v502_v6 = vadd.f32 %v498_v5, %v486_v3  ;;  %v503_v7 = vadd.f32 %v498_v5, %v487_v4 }
 0x16e   : >> { %v507_v9 = vmax.f32 %v503_v7, 0.0  ;;  %v506_v11 = vmax.f32 %v502_v6, 0.0 }
 0x170   : >> { %v513_v12 = vpack.c.bf16 %v507_v9, %v505_v8  ;;  %v512_v13 = vpack.c.bf16 %v506_v11, %v504_v10 }
 0x172   : >> { %531 = vmatprep.subr.bf16.mxu0 %v513_v12  ;;  %813 = vmatprep.subr.bf16.mxu1 %v513_v12 }
 0x173   : >> { %532 = vmatpush1.bf16.msra.mxu0 %v512_v13  ;;  %814 = vmatpush1.bf16.msra.mxu1 %v512_v13 }
 0x176   : >> { %802 = vmatmul.mubr.msk.bf16.vlgmr.msra.gmra.mrb[0].mxu0 %vm524_vm3, %v863_v14  ;;  %803 = vmatmul.mubr.msk.bf16.vlgmr.msra.gmra.mrb[0].mxu1 %vm524_vm3, %v864_v15 }
 0x249   : >> { %v565_v16 = vpop.f32.mrb[0].mxu0  ;;  %v575_v17 = vpop.f32.mrb[0].mxu1 }
 0x24a   : >> { %v613_v18 = vmul.f32 %v565_v16, %v565_v16  ;;  %v567_v19 = vpop.f32.mrb[1].mxu0  ;;  %v617_v20 = vmul.f32 %v575_v17, %v575_v17  ;;  %v577_v21 = vpop.f32.mrb[1].mxu1 }
 0x24b   : >> { %v614_v22 = vmul.f32 %v567_v19, %v567_v19  ;;  %v569_v23 = vpop.f32.mrb[2].mxu0  ;;  %v618_v24 = vmul.f32 %v577_v21, %v577_v21  ;;  %v579_v25 = vpop.f32.mrb[2].mxu1  ;;  %v588_v26 = vadd.f32 %v567_v19, %v565_v16  ;;  %v594_v27 = vadd.f32 %v577_v21, %v575_v17 }
 0x24c   : >> { %v615_v28 = vmul.f32 %v569_v23, %v569_v23  ;;  %v571_v29 = vpop.f32.mrb[3].mxu0  ;;  %v619_v30 = vmul.f32 %v579_v25, %v579_v25  ;;  %v581_v31 = vpop.f32.mrb[3].mxu1 }
 0x24d   : >> { %v591_v32 = vadd.f32 %v571_v29, %v569_v23  ;;  %v616_v33 = vmul.f32 %v571_v29, %v571_v29  ;;  %v597_v34 = vadd.f32 %v581_v31, %v579_v25  ;;  %v620_v35 = vmul.f32 %v581_v31, %v581_v31  ;;  %589 = vadd.xlane.f32.xlu0 %v588_v26 }
 0x24e   : >> { %v621_v36 = vadd.f32 %v614_v22, %v613_v18  ;;  %v627_v37 = vadd.f32 %v618_v24, %v617_v20 }
 0x24f   : >> { %592 = vadd.xlane.f32.xlu1 %v591_v32  ;;  %v624_v38 = vadd.f32 %v616_v33, %v615_v28  ;;  %v630_v39 = vadd.f32 %v620_v35, %v619_v30 }
 0x251   : >> { %595 = vadd.xlane.f32.xlu0 %v594_v27 }
 0x253   : >> { %622 = vadd.xlane.f32.xlu1 %v621_v36 }
 0x255   : >> { %598 = vadd.xlane.f32.xlu0 %v597_v34 }
 0x257   : >> { %628 = vadd.xlane.f32.xlu1 %v627_v37 }
 0x259   : >> { %625 = vadd.xlane.f32.xlu0 %v624_v38 }
 0x25d   : >> { %631 = vadd.xlane.f32.xlu0 %v630_v39 }
 0x2da   : >> { %v590_v41 = vpop.xlane.xlu0 %589 }
 0x2db   : >> { %v600_v43 = vadd.f32 %v590_v41, %v584_v40 }
 0x2dc   : >> { %v593_v44 = vpop.xlane.xlu1 %592 }
 0x2dd   : >> { %605 = vst.msk [vmem:[%s1286_s8] sm:$0xff] %vm604_vm4, %v600_v43  ;;  %v601_v46 = vadd.f32 %v593_v44, %v585_v42 }
 0x2de   : >> { %v596_v47 = vpop.xlane.xlu0 %595 }
 0x2df   : >> { %606 = vst.msk [vmem:[%s1286_s8 + $0x8] sm:$0xff] %vm604_vm4, %v601_v46  ;;  %v602_v49 = vadd.f32 %v596_v47, %v586_v45 }
 0x2e0   : >> { %v623_v50 = vpop.xlane.xlu1 %622 }
 0x2e1   : >> { %607 = vst.msk [vmem:[%s1286_s8 + $0x10] sm:$0xff] %vm604_vm4, %v602_v49  ;;  %v633_v52 = vadd.f32 %v623_v50, %v609_v48 }
 0x2e2   : >> { %v599_v53 = vpop.xlane.xlu0 %598 }
 0x2e3   : >> { %637 = vst.msk [vmem:[%s1287_s9] sm:$0xff] %vm604_vm4, %v633_v52  ;;  %v603_v55 = vadd.f32 %v599_v53, %v587_v51 }
 0x2e4   : >> { %v629_v56 = vpop.xlane.xlu1 %628 }
 0x2e5   : >> { %608 = vst.msk [vmem:[%s1286_s8 + $0x18] sm:$0xff] %vm604_vm4, %v603_v55  ;;  %v635_v58 = vadd.f32 %v629_v56, %v611_v54 }
 0x2e6   : >> { %v626_v59 = vpop.xlane.xlu0 %625 }
 0x2e7   : >> { %639 = vst.msk [vmem:[%s1287_s9 + $0x10] sm:$0xff] %vm604_vm4, %v635_v58  ;;  %v634_v60 = vadd.f32 %v626_v59, %v610_v57  ;;  %463 = sbr.rel (!%p461_p9) target bundleno = 228 (0xe4), region = 141 }
 0x2e9   : >> { %638 = vst.msk [vmem:[%s1287_s9 + $0x8] sm:$0xff] %vm604_vm4, %v634_v60 }
 0x2ea   : >> { %v632_v62 = vpop.xlane.xlu0 %631 }
 0x2eb   : >> { %v636_v63 = vadd.f32 %v632_v62, %v612_v61 }
 0x2ed   : >> { %640 = vst.msk [vmem:[%s1287_s9 + $0x18] sm:$0xff] %vm604_vm4, %v636_v63 }
 0x2ee PF: > { %644 = sbr.rel (!%p455_p7) target bundleno = 781 (0x30d), region = 78  ;;  %v645_v0 = vld [vmem:[%s1286_s8] sm:$0xff] (%p455_p7)  ;;  %v646_v4 = vld [vmem:[%s1286_s8 + $0x8] sm:$0xff] (%p455_p7)  ;;  %v647_v8 = vld [vmem:[%s1286_s8 + $0x10] sm:$0xff] (%p455_p7)  ;;  %vm685_vm5 = vcmask (%p455_p7), 7168  }
 0x2ef   : > { %v653_v1 = vld [vmem:[%s1287_s9] sm:$0xff] (%p455_p7)  ;;  %v649_v2 = vmul.f32 (%p455_p7), 0.001953125, %v645_v0  ;;  %v650_v6 = vmul.f32 (%p455_p7), 0.001953125, %v646_v4  ;;  %v655_v9 = vld [vmem:[%s1287_s9 + $0x10] sm:$0xff] (%p455_p7)  ;;  %v651_v11 = vmul.f32 (%p455_p7), 0.001953125, %v647_v8  ;;  %v648_v13 = vld [vmem:[%s1286_s8 + $0x18] sm:$0xff] (%p455_p7) }
 0x2f0   : > { %v657_v3 = vmul.f32 (%p455_p7), 0.001953125, %v653_v1  ;;  %v654_v5 = vld [vmem:[%s1287_s9 + $0x8] sm:$0xff] (%p455_p7)  ;;  %v659_v12 = vmul.f32 (%p455_p7), 0.001953125, %v655_v9  ;;  %v652_v16 = vmul.f32 (%p455_p7), 0.001953125, %v648_v13  ;;  %v669_v28 = vld [vmem:[%s1281_s3] sm:$0xff] (%p455_p7)  ;;  %v671_v31 = vld [vmem:[%s1281_s3 + $0x10] sm:$0xff] (%p455_p7) }
 0x2f1   : > { %v658_v7 = vmul.f32 (%p455_p7), 0.001953125, %v654_v5  ;;  %v661_v10 = vmul.f32 (%p455_p7), %v649_v2, %v649_v2  ;;  %v662_v15 = vmul.f32 (%p455_p7), %v650_v6, %v650_v6  ;;  %v663_v19 = vmul.f32 (%p455_p7), %v651_v11, %v651_v11  ;;  %v670_v29 = vld [vmem:[%s1281_s3 + $0x8] sm:$0xff] (%p455_p7)  ;;  %v672_v34 = vld [vmem:[%s1281_s3 + $0x18] sm:$0xff] (%p455_p7)  ;;  %v690_v37 = vld [vmem:[%s1282_s4] sm:$0xff] (%p455_p7) }
 0x2f2   : > { %v664_v21 = vmul.f32 (%p455_p7), %v652_v16, %v652_v16  ;;  %v691_v41 = vld [vmem:[%s1282_s4 + $0x8] sm:$0xff] (%p455_p7)  ;;  %v692_v44 = vld [vmem:[%s1282_s4 + $0x10] sm:$0xff] (%p455_p7)  ;;  %v693_v47 = vld [vmem:[%s1282_s4 + $0x18] sm:$0xff] (%p455_p7) }
 0x2f3   : > { %v665_v18 = vsub.f32 (%p455_p7), %v657_v3, %v661_v10  ;;  %v666_v20 = vsub.f32 (%p455_p7), %v658_v7, %v662_v15  ;;  %v667_v23 = vsub.f32 (%p455_p7), %v659_v12, %v663_v19 }
 0x2f4   : > { %v656_v14 = vld [vmem:[%s1287_s9 + $0x18] sm:$0xff] (%p455_p7) }
 0x2f5   : > { %v660_v17 = vmul.f32 0.001953125, %v656_v14  ;;  %v673_v22 = vadd.f32 1e-05, %v665_v18  ;;  %v674_v24 = vadd.f32 1e-05, %v666_v20 }
 0x2f6   : > { %v675_v26 = vadd.f32 1e-05, %v667_v23 }
 0x2f7   : > { %v668_v25 = vsub.f32 %v660_v17, %v664_v21  ;;  %865 = vrsqrt.f32 %v673_v22 }
 0x2f8   : > { %867 = vrsqrt.f32 %v674_v24 }
 0x2f9   : > { %v676_v27 = vadd.f32 1e-05, %v668_v25  ;;  %869 = vrsqrt.f32 %v675_v26 }
 0x2fb   : > { %871 = vrsqrt.f32 %v676_v27 }
 0x301   : > { %v866_v30 = vpop.eup %865 }
 0x302   : > { %v868_v32 = vpop.eup %867  ;;  %v681_v33 = vmul.f32 %v866_v30, %v669_v28 }
 0x303   : > { %v870_v35 = vpop.eup %869  ;;  %v682_v36 = vmul.f32 %v868_v32, %v670_v29 }
 0x304   : > { %686 = vst.msk [vmem:[%s1286_s8] sm:$0xff] %vm685_vm5, %v681_v33  ;;  %v694_v39 = vmul.f32 %v681_v33, %v649_v2  ;;  %v683_v40 = vmul.f32 %v870_v35, %v671_v31 }
 0x305   : > { %v872_v38 = vpop.eup %871  ;;  %687 = vst.msk [vmem:[%s1286_s8 + $0x8] sm:$0xff] %vm685_vm5, %v682_v36  ;;  %v695_v42 = vmul.f32 %v682_v36, %v650_v6 }
 0x306   : > { %v684_v43 = vmul.f32 %v872_v38, %v672_v34  ;;  %688 = vst.msk [vmem:[%s1286_s8 + $0x10] sm:$0xff] %vm685_vm5, %v683_v40  ;;  %v696_v45 = vmul.f32 %v683_v40, %v651_v11  ;;  %v698_v46 = vsub.f32 %v690_v37, %v694_v39 }
 0x307   : > { %v699_v49 = vsub.f32 %v691_v41, %v695_v42 }
 0x308   : > { %689 = vst.msk [vmem:[%s1286_s8 + $0x18] sm:$0xff] %vm685_vm5, %v684_v43  ;;  %v697_v48 = vmul.f32 %v684_v43, %v652_v16  ;;  %702 = vst.msk [vmem:[%s1287_s9] sm:$0xff] %vm685_vm5, %v698_v46  ;;  %v700_v50 = vsub.f32 %v692_v44, %v696_v45 }
 0x309   : > { %703 = vst.msk [vmem:[%s1287_s9 + $0x8] sm:$0xff] %vm685_vm5, %v699_v49 }
 0x30a   : > { %v701_v51 = vsub.f32 %v693_v47, %v697_v48  ;;  %704 = vst.msk [vmem:[%s1287_s9 + $0x10] sm:$0xff] %vm685_vm5, %v700_v50 }
 0x30c   : > { %705 = vst.msk [vmem:[%s1287_s9 + $0x18] sm:$0xff] %vm685_vm5, %v701_v51 }
 0x30d PF: > { %s20_s11 = sadd.s32 1, %s903_s11   ;;  %s1288_s30 = smov %s899_s10 }
 0x30e   : > { %p17_p10 = scmp.ge.s32.totalorder %s20_s11, 4   ;;  %s1289_s10 = smov %s1291_s12 }
 0x310   :  { %19 = sbr.rel (!%p17_p10) target bundleno = 2 (0x2), region = 152 }

</bundles_post_ra>
